<compile_context>
chip_gen: v5e
topology: v5e:2x2
jax: 0.10.0
libtpu: 0.0.40
codegen_flags: <defaults>
</compile_context>

<pallas_src>
import jax
import jax.numpy as jnp
from jax.experimental import pallas as pl
from jax.experimental.pallas import tpu as pltpu

BN_EPS = 1e-5    # nn.BatchNorm2d default eps
MAG_EPS = 1e-6   # denominator eps in the module


def _pick_tile(n, unit, target):
    """Largest divisor of n that is a multiple of `unit` and <= ~target.
    Falls back to the full dimension when n is not a multiple of `unit`
    (full-dim blocks are always legal)."""
    if n % unit != 0:
        return n
    t = min(n, max(unit, (target // unit) * unit))
    t = (t // unit) * unit
    while n % t != 0:
        t -= unit
    return t


def _stats_kernel(x_ref, sum_ref, ssq_ref):
    # x_ref: [1, 2, Ct, St];  sum_ref/ssq_ref: [Ct, 1] resident accumulators
    b = pl.program_id(1)
    s = pl.program_id(2)

    @pl.when((b == 0) & (s == 0))
    def _():
        sum_ref[...] = jnp.zeros_like(sum_ref)
        ssq_ref[...] = jnp.zeros_like(ssq_ref)

    xr = x_ref[0, 0].astype(jnp.float32)
    xi = x_ref[0, 1].astype(jnp.float32)
    sq = xr * xr + xi * xi                     # |z|^2  (no sqrt needed)
    sum_ref[...] += jnp.sum(jnp.sqrt(sq), axis=-1, keepdims=True)
    ssq_ref[...] += jnp.sum(sq, axis=-1, keepdims=True)


def _apply_kernel(scale_ref, shift_ref, x_ref, o_ref):
    # scale/shift: [Ct, 1] f32;  x_ref/o_ref: [1, 2, Ct, St]
    xr = x_ref[0, 0].astype(jnp.float32)
    xi = x_ref[0, 1].astype(jnp.float32)
    mag = jnp.sqrt(xr * xr + xi * xi)
    normalized = mag * scale_ref[...] + shift_ref[...]   # folded BN affine
    factor = normalized / (mag + MAG_EPS)
    o_ref[0, 0] = (xr * factor).astype(o_ref.dtype)
    o_ref[0, 1] = (xi * factor).astype(o_ref.dtype)


def vncbn(x, gamma, beta):
    """x: [B, 2, C, H, W]; gamma, beta: [C] (BatchNorm2d affine params)."""
    B, two, C, H, W = x.shape
    assert two == 2
    S = H * W

    # Free reshape (trailing contiguous dims merge) — no HBM transpose.
    x4 = x.reshape(B, 2, C, S)

    ct = _pick_tile(C, 8, 64)       # sublane tile (multiple of 8 or full C)
    st = _pick_tile(S, 128, 2048)   # lane tile (multiple of 128 or full H*W)
    grid = (C // ct, B, S // st)

    x_spec = pl.BlockSpec((1, 2, ct, st), lambda c, b, s: (b, 0, c, s))
    stat_spec = pl.BlockSpec((ct, 1), lambda c, b, s: (c, 0))

    # ---- Pass 1: per-channel sum(|z|), sum(|z|^2) (one read of x). ----
    mag_sum, mag_ssq = pl.pallas_call(
        _stats_kernel,
        out_shape=(
            jax.ShapeDtypeStruct((C, 1), jnp.float32),
            jax.ShapeDtypeStruct((C, 1), jnp.float32),
        ),
        grid=grid,
        in_specs=[x_spec],
        out_specs=(stat_spec, stat_spec),
        compiler_params=pltpu.CompilerParams(
            dimension_semantics=("parallel", "arbitrary", "arbitrary")
        ),
    )(x4)

    # ---- Tiny per-channel math in plain JAX: fold affine into scale/shift.
    count = float(B * S)
    mean = mag_sum[:, 0] / count
    var = jnp.maximum(mag_ssq[:, 0] / count - mean * mean, 0.0)  # biased var
    inv = jax.lax.rsqrt(var + BN_EPS)
    scale = gamma.astype(jnp.float32) * inv
    shift = beta.astype(jnp.float32) - mean * scale
    scale2 = scale.reshape(C, 1)
    shift2 = shift.reshape(C, 1)

    # ---- Pass 2: y = x * (|z|*scale + shift) / (|z| + 1e-6). ----
    y4 = pl.pallas_call(
        _apply_kernel,
        out_shape=jax.ShapeDtypeStruct((B, 2, C, S), x.dtype),
        grid=grid,
        in_specs=[stat_spec, stat_spec, x_spec],
        out_specs=x_spec,
        compiler_params=pltpu.CompilerParams(
            dimension_semantics=("parallel", "parallel", "arbitrary")
        ),
    )(scale2, shift2, x4)

    return y4.reshape(B, 2, C, H, W)


if __name__ == "__main__":
    B, C, H, W = 2, 4, 16, 16
    key = jax.random.PRNGKey(0)
    x = jax.random.normal(key, (B, 2, C, H, W), dtype=jnp.float32)

    # nn.BatchNorm2d(channels) default init: weight (gamma) = 1, bias (beta) = 0.
    gamma = jnp.ones((C,), dtype=jnp.float32)
    beta = jnp.zeros((C,), dtype=jnp.float32)

    y = jax.block_until_ready(vncbn(x, gamma, beta))

    # Pure-JAX reference (training-mode BN on the magnitude).
    mag = jnp.sqrt(jnp.sum(x * x, axis=1))                      # [B, C, H, W]
    mean = jnp.mean(mag, axis=(0, 2, 3), keepdims=True)
    var = jnp.mean((mag - mean) ** 2, axis=(0, 2, 3), keepdims=True)
    normalized = ((mag - mean) / jnp.sqrt(var + BN_EPS)
                  * gamma.reshape(1, -1, 1, 1) + beta.reshape(1, -1, 1, 1))
    ref = x * (normalized / (mag + MAG_EPS))[:, None]

    err = jnp.max(jnp.abs(y - ref))
    assert err < 1e-4, f"max abs err {err}"

    # TODO(synk): BatchNorm2d running_mean/running_var state updates are a
    # training side effect and do not affect this forward output; not modeled.
    print("KERNEL_OK")
</pallas_src>

<mosaic_0001>
module attributes {stable_mosaic.version = 11 : i64} {
  func.func @_stats_kernel(%arg0: i32, %arg1: i32, %arg2: i32, %arg3: memref<1x2x4x256xf32, #tpu.memory_space<vmem>>, %arg4: memref<4x1xf32, #tpu.memory_space<vmem>>, %arg5: memref<4x1xf32, #tpu.memory_space<vmem>>) attributes {dimension_semantics = [#tpu.dimension_semantics<parallel>, #tpu.dimension_semantics<arbitrary>, #tpu.dimension_semantics<arbitrary>], iteration_bounds = array<i64: 1, 2, 1>, scalar_prefetch = 0 : i64, scratch_operands = 0 : i64, tpu.core_type = #tpu.core_type<tc>, window_params = [{transform_indices = @transform_0, window_bounds = array<i64: 1, 2, 4, 256>}, {transform_indices = @transform_1, window_bounds = array<i64: 4, 1>}, {transform_indices = @transform_2, window_bounds = array<i64: 4, 1>}]} {
    %c0_i32 = arith.constant 0 : i32
    %0 = arith.cmpi eq, %arg1, %c0_i32 : i32
    %c0_i32_0 = arith.constant 0 : i32
    %1 = arith.cmpi eq, %arg2, %c0_i32_0 : i32
    %2 = arith.andi %0, %1 : i1
    %3 = arith.extui %2 : i1 to i32
    %c0_i32_1 = arith.constant 0 : i32
    %4 = arith.cmpi ne, %3, %c0_i32_1 : i32
    scf.if %4 {
      %cst_17 = arith.constant 0.000000e+00 : f32
      %23 = vector.broadcast %cst_17 : f32 to vector<4x1xf32>
      %c0_18 = arith.constant 0 : index
      %c0_19 = arith.constant 0 : index
      %24 = vector.load %arg4[%c0_18, %c0_19] : memref<4x1xf32, #tpu.memory_space<vmem>>, vector<4x1xf32>
      tpu.vector_store %arg4[%c0_18, %c0_19], %23 {strides = array<i32>} : memref<4x1xf32, #tpu.memory_space<vmem>>, vector<4x1xf32>,
      %cst_20 = arith.constant 0.000000e+00 : f32
      %25 = vector.broadcast %cst_20 : f32 to vector<4x1xf32>
      %c0_21 = arith.constant 0 : index
      %c0_22 = arith.constant 0 : index
      %26 = vector.load %arg5[%c0_21, %c0_22] : memref<4x1xf32, #tpu.memory_space<vmem>>, vector<4x1xf32>
      tpu.vector_store %arg5[%c0_21, %c0_22], %25 {strides = array<i32>} : memref<4x1xf32, #tpu.memory_space<vmem>>, vector<4x1xf32>,
    } else {
    }
    %c0 = arith.constant 0 : index
    %c0_2 = arith.constant 0 : index
    %c0_3 = arith.constant 0 : index
    %c0_4 = arith.constant 0 : index
    %5 = vector.load %arg3[%c0, %c0_2, %c0_3, %c0_4] : memref<1x2x4x256xf32, #tpu.memory_space<vmem>>, vector<1x1x4x256xf32>
    %6 = vector.shape_cast %5 : vector<1x1x4x256xf32> to vector<4x256xf32>
    %c0_5 = arith.constant 0 : index
    %c1 = arith.constant 1 : index
    %c0_6 = arith.constant 0 : index
    %c0_7 = arith.constant 0 : index
    %7 = vector.load %arg3[%c0_5, %c1, %c0_6, %c0_7] : memref<1x2x4x256xf32, #tpu.memory_space<vmem>>, vector<1x1x4x256xf32>
    %8 = vector.shape_cast %7 : vector<1x1x4x256xf32> to vector<4x256xf32>
    %9 = arith.mulf %6, %6 : vector<4x256xf32>
    %10 = arith.mulf %8, %8 : vector<4x256xf32>
    %11 = arith.addf %9, %10 : vector<4x256xf32>
    %c0_8 = arith.constant 0 : index
    %c0_9 = arith.constant 0 : index
    %12 = vector.load %arg4[%c0_8, %c0_9] : memref<4x1xf32, #tpu.memory_space<vmem>>, vector<4x1xf32>
    %13 = math.sqrt %11 : vector<4x256xf32>
    %cst = arith.constant dense<0.000000e+00> : vector<4xf32>
    %14 = vector.multi_reduction <add>, %13, %cst [1] : vector<4x256xf32> to vector<4xf32>
    %15 = vector.shape_cast %14 : vector<4xf32> to vector<4x1xf32>
    %16 = arith.addf %12, %15 : vector<4x1xf32>
    %c0_10 = arith.constant 0 : index
    %c0_11 = arith.constant 0 : index
    %17 = vector.load %arg4[%c0_10, %c0_11] : memref<4x1xf32, #tpu.memory_space<vmem>>, vector<4x1xf32>
    tpu.vector_store %arg4[%c0_10, %c0_11], %16 {strides = array<i32>} : memref<4x1xf32, #tpu.memory_space<vmem>>, vector<4x1xf32>,
    %c0_12 = arith.constant 0 : index
    %c0_13 = arith.constant 0 : index
    %18 = vector.load %arg5[%c0_12, %c0_13] : memref<4x1xf32, #tpu.memory_space<vmem>>, vector<4x1xf32>
    %cst_14 = arith.constant dense<0.000000e+00> : vector<4xf32>
    %19 = vector.multi_reduction <add>, %11, %cst_14 [1] : vector<4x256xf32> to vector<4xf32>
    %20 = vector.shape_cast %19 : vector<4xf32> to vector<4x1xf32>
    %21 = arith.addf %18, %20 : vector<4x1xf32>
    %c0_15 = arith.constant 0 : index
    %c0_16 = arith.constant 0 : index
    %22 = vector.load %arg5[%c0_15, %c0_16] : memref<4x1xf32, #tpu.memory_space<vmem>>, vector<4x1xf32>
    tpu.vector_store %arg5[%c0_15, %c0_16], %21 {strides = array<i32>} : memref<4x1xf32, #tpu.memory_space<vmem>>, vector<4x1xf32>,
    return
  }
  func.func @transform_0(%arg0: i32, %arg1: i32, %arg2: i32) -> (i32, i32, i32, i32) {
    %c0_i32 = arith.constant 0 : i32
    %c0_i32_0 = arith.constant 0 : i32
    return %arg1, %c0_i32, %arg0, %arg2 : i32, i32, i32, i32
  }
  func.func @transform_1(%arg0: i32, %arg1: i32, %arg2: i32) -> (i32, i32) {
    %c0_i32 = arith.constant 0 : i32
    %c0_i32_0 = arith.constant 0 : i32
    return %arg0, %c0_i32 : i32, i32
  }
  func.func @transform_2(%arg0: i32, %arg1: i32, %arg2: i32) -> (i32, i32) {
    %c0_i32 = arith.constant 0 : i32
    %c0_i32_0 = arith.constant 0 : i32
    return %arg0, %c0_i32 : i32, i32
  }
}

</mosaic_0001>

<bundles_post_ra>
// kernel: tpu_custom_call.1
= control target key start
LH: loop header
LB: loop body
LE: loop exit
PB: predicated region body
PF: predicated region fallthrough
CT: control target
= control target key end

     0   :  { %8 = vsyncpa [#allocation3], 0  ;;  %s644_s0 = inlined_call_operand.hbm [shape: f32[2,2,4,256], index: 0, kind: input, shape index: {}]   ;;  %s645_s1 = inlined_call_operand.vmem [shape: f32[4,1], index: 1, kind: output, shape index: {0}]   ;;  %s646_s2 = inlined_call_operand.vmem [shape: f32[4,1], index: 2, kind: output, shape index: {1}]  }
   0x1   :  { %10 = vsyncpa [#allocation3 + $0x1], 0  ;;  %s542_s9 = smov 0   ;;  %s544_s10 = smov 0  }
   0x2   :  { %s546_s11 = smov 0   ;;  %s548_s12 = smov 0  }
   0x3   :  { %s550_s13 = smov 0   ;;  %s552_s14 = smov 0  }
   0x4 LB: > { %s366_s15 = sadd.s32 4294967295, %s522_s14   ;;  %s31_s16 = sadd.s32 1, %s518_s13  ;;  %s522_s14 = sphi %s552_s14, %s16_s14   ;;  %s518_s13 = sphi %s550_s13, %s653_s13   ;;  %s514_s12 = sphi %s548_s12, %s652_s12   ;;  %s510_s11 = sphi %s546_s11, %s651_s11   ;;  %s506_s10 = sphi %s544_s10, %s650_s10   ;;  %s502_s9 = sphi %s542_s9, %s649_s9  }
   0x5   : > { %p33_p0 = scmp.ge.s32.totalorder %s31_s16, 2  ;;  %s46_s17 = sadd.s32 1, %s510_s11 }
   0x6   : > { %p53_p1 = scmp.ne.s32.totalorder %s510_s11, %s506_s10  ;;  %p54_p2 = scmp.eq.s32.totalorder %s522_s14, 0 }
   0x7   : > { %s655_s16 = smov (%p33_p0, %s31_s16), 0  ;;  %p59_p4 = scmp.ne.s32.totalorder %s506_s10, %s502_s9 }
   0x8   : > { %p578_p3 = por %p54_p2, %p53_p1  ;;  %s39_s19 = ssub.s32 %s518_s13, %s655_s16 }
   0x9   : > { %p60_p5 = scmp.eq.s32.totalorder %s366_s15, 0  ;;  %p44_p6 = scmp.eq.s32.totalorder %s39_s19, 0 }
   0xa   : > { %p388_p8 = scmp.lt.s32.totalorder %s522_s14, 2  ;;  %s135_s22 = sand.u32 1, %s510_s11  }
   0xb   : > { %p585_p7 = por %p60_p5, %p59_p4  ;;  %s380_s23 = sshll.u32 %s518_s13, 4 }
   0xc   : > { %s591_s21 = scalar_select %p44_p6, %s510_s11, %s46_s17  }
   0xd   : > { %s369_s24 = sshll.u32 %s135_s22, 4  ;;  %s148_s27 = scalar_lea.hbm %s644_s0, %s380_s23 }
   0xe   : > { %s149_s28 = sshll.u32 %s148_s27, 4  ;;  %s139_s29 = scalar_lea.vmem [#allocation2], %s369_s24  ;;  %s150_s28 = int_to_ptr.hbm [resolvable:$true] %s149_s28 }
   0xf   : > { %s151_s30 = sshll.u32 %s139_s29, 4  ;;  %p385_p9 = pnand %p388_p8, %p578_p3  ;;  %s152_s30 = int_to_ptr.vmem [resolvable:$true] %s151_s30 }
  0x10   : > { %p372_p10 = scmp.ge.s32.totalorder %s522_s14, 1  ;;  %p159_p11 = scmp.lt.s32.totalorder %s522_s14, 3 }
  0x11   : > { %s136_s3 = scalar_lea.sflag [#allocation3], %s135_s22  ;;  %s524_s4 = smov 128  }
  0x12   : > { %s525_s5 = smov 8   ;;  %p160_p12 = pnand %p372_p10, %p159_p11 }
  0x13   : > { %387 = dma.hbm_to_vmem [thread:$0]  (!%p385_p9), %s150_s28, 256, %s152_s30, %s136_s3, %s524_s4, %s524_s4, %s525_s5  }
  0x14   : > { %163 = sbr.rel (%p160_p12) target bundleno = 197 (0xc5), region = 24  ;;  %s165_s6 = sand.u32 (!%p160_p12), 1, %s506_s10  }
  0x15   : > { %s373_s7 = sshll.u32 (!%p160_p12), %s165_s6, 4  ;;  %s166_s8 = scalar_lea.sflag (!%p160_p12), [#allocation3], %s165_s6 }
  0x16   : > { %s169_s9 = scalar_lea.vmem (!%p160_p12), [#allocation2], %s373_s7 }
  0x19   : > { %497 = dma.done.wait (%p585_p7), %s166_s8, 256  }
  0x1a   : > { %499 = vsyncadd (%p585_p7), %s166_s8, 4294967040  ;;  %p203_p13 = scmp.eq.s32.totalorder %s514_s12, 0 }
  0x1b   : > { %vm209_vm0 = vcmask (%p203_p13), 3072   ;;  %v526_v0 = vmov (%p203_p13), 0.0  }
  0x1c   : > { %208 = sbr.rel (!%p203_p13) target bundleno = 33 (0x21), region = 32  ;;  %210 = vst.msk [vmem:[%s645_s1] sm:$0xf] (%p203_p13), %vm209_vm0, %v526_v0 }
  0x1d   : > { %211 = vst.msk [vmem:[%s646_s2] sm:$0xf] (%p203_p13), %vm209_vm0, %v526_v0 }
  0x21 PF: > { %v212_v1 = vld [vmem:[%s169_s9] sm:$0xff]  ;;  %v375_v2 = vld [vmem:[%s169_s9 + $0x8] sm:$0xff]  ;;  %vm237_vm3 = vcmask 1043456   ;;  %vm244_vm4 = vcmask 3072  }
  0x22   : > { %v215_v3 = vmul.f32 %v212_v1, %v212_v1  ;;  %v216_v4 = vmul.f32 %v375_v2, %v375_v2 }
  0x23   : > { %v218_v26 = vld [vmem:[%s645_s1] sm:$0xf] }
  0x24   : > { %v217_v5 = vadd.f32 %v216_v4, %v215_v3  ;;  %v246_v29 = vld [vmem:[%s646_s2] sm:$0xf] }
  0x26   : > { %440 = vrsqrt.f32 %v217_v5  ;;  %vm226_vm1 = vcmp.eq.f32.partialorder %v217_v5, inf  ;;  %v229_v12 = vand.u32 2147483648, %v217_v5  ;;  %vm228_vm2 = vcmp.eq.f32.partialorder %v217_v5, 0.0 }
  0x2c   : > { %v441_v6 = vpop.eup %440 }
  0x2d   : > { %v220_v7 = vmul.f32 %v441_v6, %v217_v5 }
  0x2f   : > { %v221_v8 = vmul.f32 %v441_v6, %v220_v7 }
  0x31   : > { %v222_v9 = vmul.f32 0.5, %v221_v8 }
  0x33   : > { %v223_v10 = vsub.f32 1.5, %v222_v9 }
  0x35   : > { %v224_v11 = vmul.f32 %v441_v6, %v223_v10 }
  0x37   : > { %v225_v13 = vmul.f32 %v224_v11, %v217_v5 }
  0x39   : > { %v227_v14 = vsel %vm226_vm1, %v217_v5, %v225_v13 }
  0x3a   : > { %v230_v15 = vsel %vm228_vm2, %v229_v12, %v227_v14 }
  0x3b   : > { %232 = vst [vmem:[#allocation1] ss:$2 sm:$0xff] %v230_v15 }
  0x42   : > { %v233_v16 = vld.sshfl [vmem:[#allocation1] sm:$0xff pattern:$0x75316420]  ;;  %v234_v17 = vld.sshfl [vmem:[#allocation1 + $0x8] sm:$0xff pattern:$0x75316420] }
  0x43   : > { %v238_v18 = vsel %vm237_vm3, %v233_v16, 0.0  ;;  %v239_v19 = vsel %vm237_vm3, %v234_v17, 0.0  ;;  %248 = vst [vmem:[#allocation1] ss:$2 sm:$0xff] %v217_v5 }
  0x44   : > { %v240_v20 = vadd.f32 %v239_v19, %v238_v18 }
  0x46   : > { %241 = vadd.xlane.f32.xlu0 %v240_v20 }
  0x4a   : > { %v249_v21 = vld.sshfl [vmem:[#allocation1] sm:$0xff pattern:$0x75316420]  ;;  %v250_v22 = vld.sshfl [vmem:[#allocation1 + $0x8] sm:$0xff pattern:$0x75316420] }
  0x4b   : > { %v253_v23 = vsel %vm237_vm3, %v249_v21, 0.0  ;;  %v254_v24 = vsel %vm237_vm3, %v250_v22, 0.0 }
  0x4c   : > { %v255_v25 = vadd.f32 %v254_v24, %v253_v23 }
  0x4e   : > { %256 = vadd.xlane.f32.xlu0 %v255_v25 }
  0xb9   : > { %v242_v27 = vpop.xlane.xlu0 %241 }
  0xba   : > { %v243_v28 = vadd.f32 %v242_v27, %v218_v26 }
  0xbc   : > { %245 = vst.msk [vmem:[%s645_s1] sm:$0xf] %vm244_vm4, %v243_v28 }
  0xc1   : > { %v257_v30 = vpop.xlane.xlu0 %256 }
  0xc2   : > { %v258_v31 = vadd.f32 %v257_v30, %v246_v29 }
  0xc4   : > { %259 = vst.msk [vmem:[%s646_s2] sm:$0xf] %vm244_vm4, %v258_v31 }
  0xc5 PF: > { %s16_s14 = sadd.s32 1, %s522_s14   ;;  %s649_s9 = smov %s506_s10 }
  0xc6   : > { %p13_p0 = scmp.ge.s32.totalorder %s16_s14, 4   ;;  %s650_s10 = smov %s510_s11 }
  0xc7   : > { %s651_s11 = smov %s591_s21  ;;  %s652_s12 = smov %s518_s13 }
  0xc8   : > { %s653_s13 = smov %s655_s16  ;;  %15 = sbr.rel (!%p13_p0) target bundleno = 4 (0x4), region = 81 }
  0xcd   :  { %293 = vsyncpa [#allocation3], 1 }
  0xce   :  { %295 = vsyncpa [#allocation3 + $0x1], 1 }

</bundles_post_ra>
